<compile_context>
chip_gen: v7x
topology: tpu7x:2x2x1
jax: 0.10.0
libtpu: 0.0.40
codegen_flags: <defaults>
</compile_context>

<pallas_src>
import functools

import jax
import jax.numpy as jnp
from jax import lax
from jax.experimental import pallas as pl
from jax.experimental.pallas import tpu as pltpu

POSE_SUBLANES = 8   # pose head padded to 8 output rows (3 real) -> full sublane tile
_POSE_T_DIMS = (((1,), (1,)), ((), ()))   # contract H of (8,H) with H of (TB,H)


# --------------------------------------------------------------------------- #
# Kernels
# --------------------------------------------------------------------------- #
def _pose_head(x_f32, z, r, wpt_ref, bpt_ref, out_ref):
    """Shared tail: gating + transposed lane-dense pose head."""
    # GRU-like gating, pure VPU work in f32:  (r * x) * z == x * (z * r)
    h_gated = x_f32 * (z * r)
    # Transposed pose head: (8, H) @ (TB, H)^T -> (8, TB) on the MXU.
    # Lanes = batch rows (multiple of 128), sublanes = 8 padded pose outputs.
    pose_t = lax.dot_general(
        wpt_ref[...], h_gated.astype(jnp.bfloat16),
        dimension_numbers=_POSE_T_DIMS,
        preferred_element_type=jnp.float32)
    out_ref[...] = (pose_t + bpt_ref[...]).astype(out_ref.dtype)


def _gated_pose_kernel_fused(x_ref, wg_ref, bg_ref, wpt_ref, bpt_ref, out_ref):
    """Fused-gate path (requires H % 128 == 0 so the column-H slice is free)."""
    x = x_ref[...]                                   # (TB, H)
    H = x.shape[-1]
    x_f32 = x.astype(jnp.float32)
    x_bf = x.astype(jnp.bfloat16)

    # Fused update/reset gates: one (TB, H) @ (H, 2H) MXU pass, f32 accumulate.
    gate_lin = jnp.dot(x_bf, wg_ref[...], preferred_element_type=jnp.float32)
    gates = jax.nn.sigmoid(gate_lin + bg_ref[...])   # f32 bias + sigmoid (VPU/EUP)
    z = gates[:, :H]                                 # update gate
    r = gates[:, H:]                                 # reset gate
    _pose_head(x_f32, z, r, wpt_ref, bpt_ref, out_ref)


def _gated_pose_kernel_split(x_ref, wz_ref, bz_ref, wr_ref, br_ref,
                             wpt_ref, bpt_ref, out_ref):
    """Fallback path for H not a multiple of 128: two separate gate matmuls."""
    x = x_ref[...]
    x_f32 = x.astype(jnp.float32)
    x_bf = x.astype(jnp.bfloat16)
    z = jax.nn.sigmoid(
        jnp.dot(x_bf, wz_ref[...], preferred_element_type=jnp.float32) + bz_ref[...])
    r = jax.nn.sigmoid(
        jnp.dot(x_bf, wr_ref[...], preferred_element_type=jnp.float32) + br_ref[...])
    _pose_head(x_f32, z, r, wpt_ref, bpt_ref, out_ref)


# --------------------------------------------------------------------------- #
# Parameter preparation (call ONCE, outside the per-step jit path)
# --------------------------------------------------------------------------- #
def prepare_params(params, matmul_dtype=jnp.bfloat16):
    """Fuse / pad / cast parameters into the kernel layout. Do this once."""
    H = params["wz"].shape[0]
    # Pose head transposed and padded to 8 sublanes (rows 0..2 are real).
    wpt = (jnp.zeros((POSE_SUBLANES, H), jnp.float32)
           .at[:3, :].set(params["wp"].T).astype(matmul_dtype))
    bpt = (jnp.zeros((POSE_SUBLANES, 1), jnp.float32)
           .at[:3, 0].set(params["bp"].reshape(-1)))
    if H % 128 == 0:
        # Fused gate weight (H, 2H) bf16; fused gate bias (1, 2H) f32.
        wg = jnp.concatenate([params["wz"], params["wr"]], axis=1).astype(matmul_dtype)
        bg = jnp.concatenate([params["bz"], params["br"]], axis=1).astype(jnp.float32)
        return dict(wg=wg, bg=bg, wpt=wpt, bpt=bpt)
    return dict(wz=params["wz"].astype(matmul_dtype),
                bz=params["bz"].astype(jnp.float32),
                wr=params["wr"].astype(matmul_dtype),
                br=params["br"].astype(jnp.float32),
                wpt=wpt, bpt=bpt)


# --------------------------------------------------------------------------- #
# Wrapper
# --------------------------------------------------------------------------- #
def _batch_tile(B: int, block_b: int) -> int:
    """Pick the batch tile. Must be a multiple of 128 (it is the lane dim of the
    transposed output) unless it equals the whole batch. Prefer >= 4 grid steps
    when the batch allows it (keeps the pipeline double-buffering and gives v7x
    megacore >= 2 steps per TensorCore)."""
    if B <= 128:
        return B
    tb = max(128, (min(block_b, B) // 128) * 128)
    if B >= 4 * 128:
        target_steps = 4
    elif B >= 2 * 128:
        target_steps = 2
    else:
        target_steps = 1
    tb = min(tb, max(128, ((B // target_steps) // 128) * 128))
    return min(tb, B)


@functools.partial(jax.jit, static_argnames=("block_b",))
def gated_pose_refinement(x, prepared, *, block_b=512):
    """x: (B, H) float32 or bfloat16. prepared: output of prepare_params()."""
    B, H = x.shape
    tb = _batch_tile(B, block_b)
    grid = (pl.cdiv(B, tb),)
    # NOTE: if B % tb != 0 the last partial tile computes sigmoid on padding
    # rows; all math here is row-wise and the padded stores are masked, so it
    # is benign -- do not add cross-row reductions without revisiting this.

    def resident(arr):   # weights stay at block (0, 0) for every grid step
        return pl.BlockSpec(arr.shape, lambda i: (0, 0))

    fused = "wg" in prepared
    if fused:
        kernel = _gated_pose_kernel_fused
        weight_args = (prepared["wg"], prepared["bg"])
    else:
        kernel = _gated_pose_kernel_split
        weight_args = (prepared["wz"], prepared["bz"],
                       prepared["wr"], prepared["br"])
    args = (x,) + weight_args + (prepared["wpt"], prepared["bpt"])

    in_specs = [pl.BlockSpec((tb, H), lambda i: (i, 0))]       # x: tiled over batch
    in_specs += [resident(a) for a in args[1:]]                # resident weights

    out_t = pl.pallas_call(
        kernel,
        out_shape=jax.ShapeDtypeStruct((POSE_SUBLANES, B), jnp.float32),
        grid=grid,
        in_specs=in_specs,
        out_specs=pl.BlockSpec((POSE_SUBLANES, tb), lambda i: (0, i)),
        compiler_params=pltpu.CompilerParams(
            dimension_semantics=("parallel",),   # megacore-shard the batch axis
        ),
    )(*args)

    # Only the first 3 rows are the real pose; transpose back to (B, 3).
    return out_t[:3, :].T.astype(x.dtype)


# --------------------------------------------------------------------------- #
# Reference + synthetic params
# --------------------------------------------------------------------------- #
def init_params(key, hidden_dim):
    """Deterministic synthetic parameters (PyTorch Linear, stored pre-transposed)."""
    ks = jax.random.split(key, 6)
    s = 1.0 / jnp.sqrt(hidden_dim)
    wz = jax.random.uniform(ks[0], (hidden_dim, hidden_dim), jnp.float32, -s, s)
    bz = jax.random.uniform(ks[1], (1, hidden_dim), jnp.float32, -s, s)
    wr = jax.random.uniform(ks[2], (hidden_dim, hidden_dim), jnp.float32, -s, s)
    br = jax.random.uniform(ks[3], (1, hidden_dim), jnp.float32, -s, s)
    wp = jax.random.uniform(ks[4], (hidden_dim, 3), jnp.float32, -s, s)
    bp = jax.random.uniform(ks[5], (1, 3), jnp.float32, -s, s)
    return dict(wz=wz, bz=bz, wr=wr, br=br, wp=wp, bp=bp)


def reference_forward(x, params):
    """Pure-JAX f32 reference of the PyTorch forward."""
    z = jax.nn.sigmoid(x @ params["wz"] + params["bz"])
    r = jax.nn.sigmoid(x @ params["wr"] + params["br"])
    h_new = r * x
    return (h_new * z) @ params["wp"] + params["bp"]


if __name__ == "__main__":
    key = jax.random.PRNGKey(0)
    k_x, k_p = jax.random.split(key)

    # Small but TPU-friendly shapes; the tile heuristic gives grid=(4,).
    batch, hidden_dim = 512, 128
    x = jax.random.normal(k_x, (batch, hidden_dim), jnp.float32)
    params = init_params(k_p, hidden_dim)
    prepared = prepare_params(params)          # fuse/pad/cast ONCE, outside jit

    out = jax.block_until_ready(gated_pose_refinement(x, prepared))
    ref = reference_forward(x, params)
    assert out.shape == (batch, 3), out.shape
    # bf16 matmul inputs with f32 accumulation -> loosened tolerance vs f32 ref.
    max_err = float(jnp.max(jnp.abs(out - ref)))
    assert max_err < 2e-2, f"f32-x path mismatch vs reference: max abs err {max_err}"

    # Optional bf16-x path: halves the dominant HBM read (gated, looser tolerance).
    out_bf = jax.block_until_ready(
        gated_pose_refinement(x.astype(jnp.bfloat16), prepared))
    assert out_bf.shape == (batch, 3), out_bf.shape
    max_err_bf = float(jnp.max(jnp.abs(out_bf.astype(jnp.float32) - ref)))
    assert max_err_bf < 6e-2, f"bf16-x path mismatch vs reference: {max_err_bf}"

    print("KERNEL_OK")
</pallas_src>

<mosaic_0001>
module attributes {stable_mosaic.version = 11 : i64} {
  func.func @_gated_pose_kernel_fused(%arg0: i32, %arg1: memref<128x128xf32, #tpu.memory_space<vmem>>, %arg2: memref<128x256xbf16, #tpu.memory_space<vmem>>, %arg3: memref<1x256xf32, #tpu.memory_space<vmem>>, %arg4: memref<8x128xbf16, #tpu.memory_space<vmem>>, %arg5: memref<8x1xf32, #tpu.memory_space<vmem>>, %arg6: memref<8x128xf32, #tpu.memory_space<vmem>>) attributes {dimension_semantics = [#tpu.dimension_semantics<parallel>], iteration_bounds = array<i64: 4>, scalar_prefetch = 0 : i64, scratch_operands = 0 : i64, tpu.core_type = #tpu.core_type<tc>, window_params = [{transform_indices = @transform_0, window_bounds = array<i64: 128, 128>}, {pipeline_mode = #tpu.pipeline_mode<synchronous>, transform_indices = @transform_1, window_bounds = array<i64: 128, 256>}, {pipeline_mode = #tpu.pipeline_mode<synchronous>, transform_indices = @transform_2, window_bounds = array<i64: 1, 256>}, {pipeline_mode = #tpu.pipeline_mode<synchronous>, transform_indices = @transform_3, window_bounds = array<i64: 8, 128>}, {pipeline_mode = #tpu.pipeline_mode<synchronous>, transform_indices = @transform_4, window_bounds = array<i64: 8, 1>}, {transform_indices = @transform_5, window_bounds = array<i64: 8, 128>}]} {
    %c0 = arith.constant 0 : index
    %c0_0 = arith.constant 0 : index
    %0 = vector.load %arg1[%c0, %c0_0] : memref<128x128xf32, #tpu.memory_space<vmem>>, vector<128x128xf32>
    %1 = arith.truncf %0 : vector<128x128xf32> to vector<128x128xbf16>
    %c0_1 = arith.constant 0 : index
    %c0_2 = arith.constant 0 : index
    %2 = vector.load %arg2[%c0_1, %c0_2] : memref<128x256xbf16, #tpu.memory_space<vmem>>, vector<128x256xbf16>
    %cst = arith.constant dense<0.000000e+00> : vector<128x256xf32>
    %3 = tpu.matmul %1, %2, %cst {dimension_numbers = #tpu.dot_dimension_numbers<[1], [0], [0], [1], [0, 0, 1, 1], [], []>} : vector<128x128xbf16>, vector<128x256xbf16>, vector<128x256xf32> -> vector<128x256xf32>
    %c0_3 = arith.constant 0 : index
    %c0_4 = arith.constant 0 : index
    %4 = vector.load %arg3[%c0_3, %c0_4] : memref<1x256xf32, #tpu.memory_space<vmem>>, vector<1x256xf32>
    %5 = vector.broadcast %4 : vector<1x256xf32> to vector<128x256xf32>
    %6 = arith.addf %3, %5 : vector<128x256xf32>
    %7 = arith.negf %6 : vector<128x256xf32>
    %8 = math.exp %7 : vector<128x256xf32>
    %cst_5 = arith.constant 1.000000e+00 : f32
    %9 = vector.broadcast %cst_5 : f32 to vector<128x256xf32>
    %10 = arith.addf %9, %8 : vector<128x256xf32>
    %11 = arith.divf %9, %10 : vector<128x256xf32>
    %12 = vector.extract_strided_slice %11 {offsets = [0, 0], sizes = [128, 128], strides = [1, 1]} : vector<128x256xf32> to vector<128x128xf32>
    %13 = vector.extract_strided_slice %11 {offsets = [0, 128], sizes = [128, 128], strides = [1, 1]} : vector<128x256xf32> to vector<128x128xf32>
    %14 = arith.mulf %12, %13 : vector<128x128xf32>
    %15 = arith.mulf %0, %14 : vector<128x128xf32>
    %c0_6 = arith.constant 0 : index
    %c0_7 = arith.constant 0 : index
    %16 = vector.load %arg4[%c0_6, %c0_7] : memref<8x128xbf16, #tpu.memory_space<vmem>>, vector<8x128xbf16>
    %17 = arith.truncf %15 : vector<128x128xf32> to vector<128x128xbf16>
    %cst_8 = arith.constant dense<0.000000e+00> : vector<8x128xf32>
    %18 = tpu.matmul %16, %17, %cst_8 {dimension_numbers = #tpu.dot_dimension_numbers<[1], [1], [0], [0], [0, 0, 1, 0], [], []>} : vector<8x128xbf16>, vector<128x128xbf16>, vector<8x128xf32> -> vector<8x128xf32>
    %c0_9 = arith.constant 0 : index
    %c0_10 = arith.constant 0 : index
    %19 = vector.load %arg5[%c0_9, %c0_10] : memref<8x1xf32, #tpu.memory_space<vmem>>, vector<8x1xf32>
    %20 = vector.broadcast %19 : vector<8x1xf32> to vector<8x128xf32>
    %21 = arith.addf %18, %20 : vector<8x128xf32>
    %c0_11 = arith.constant 0 : index
    %c0_12 = arith.constant 0 : index
    %22 = vector.load %arg6[%c0_11, %c0_12] : memref<8x128xf32, #tpu.memory_space<vmem>>, vector<8x128xf32>
    tpu.vector_store %arg6[%c0_11, %c0_12], %21 {strides = array<i32>} : memref<8x128xf32, #tpu.memory_space<vmem>>, vector<8x128xf32>,
    return
  }
  func.func @transform_0(%arg0: i32) -> (i32, i32) {
    %c0_i32 = arith.constant 0 : i32
    %c0_i32_0 = arith.constant 0 : i32
    return %arg0, %c0_i32 : i32, i32
  }
  func.func @transform_1(%arg0: i32) -> (i32, i32) {
    %c0_i32 = arith.constant 0 : i32
    %c0_i32_0 = arith.constant 0 : i32
    %c0_i32_1 = arith.constant 0 : i32
    return %c0_i32, %c0_i32_0 : i32, i32
  }
  func.func @transform_2(%arg0: i32) -> (i32, i32) {
    %c0_i32 = arith.constant 0 : i32
    %c0_i32_0 = arith.constant 0 : i32
    %c0_i32_1 = arith.constant 0 : i32
    return %c0_i32, %c0_i32_0 : i32, i32
  }
  func.func @transform_3(%arg0: i32) -> (i32, i32) {
    %c0_i32 = arith.constant 0 : i32
    %c0_i32_0 = arith.constant 0 : i32
    %c0_i32_1 = arith.constant 0 : i32
    return %c0_i32, %c0_i32_0 : i32, i32
  }
  func.func @transform_4(%arg0: i32) -> (i32, i32) {
    %c0_i32 = arith.constant 0 : i32
    %c0_i32_0 = arith.constant 0 : i32
    %c0_i32_1 = arith.constant 0 : i32
    return %c0_i32, %c0_i32_0 : i32, i32
  }
  func.func @transform_5(%arg0: i32) -> (i32, i32) {
    %c0_i32 = arith.constant 0 : i32
    %c0_i32_0 = arith.constant 0 : i32
    return %c0_i32, %arg0 : i32, i32
  }
}

</mosaic_0001>

<bundles_post_ra>
// kernel: gated_pose_refinement.1
= control target key start
LH: loop header
LB: loop body
LE: loop exit
PB: predicated region body
PF: predicated region fallthrough
CT: control target
= control target key end

     0   :  { %10 = vsyncpa [#allocation3], 0  ;;  %s1587_s0 = inlined_call_operand.hbm [shape: f32[512,128], index: 0, kind: input, shape index: {}]   ;;  %s1588_s1 = inlined_call_operand.hbm [shape: bf16[128,256], index: 1, kind: input, shape index: {}]   ;;  %s1589_s2 = inlined_call_operand.vmem [shape: f32[1,256], index: 2, kind: input, shape index: {}]   ;;  %s1590_s3 = inlined_call_operand.vmem [shape: bf16[8,128], index: 3, kind: input, shape index: {}]   ;;  %s1591_s4 = inlined_call_operand.vmem [shape: f32[8,1], index: 4, kind: input, shape index: {}]   ;;  %s1592_s5 = inlined_call_operand.vmem [shape: f32[8,512], index: 5, kind: output, shape index: {}]  }
   0x1   :  { %12 = vsyncpa [#allocation3 + $0x1], 0 }
   0x2   :  { %13 = vsyncpa [#allocation5], 0  ;;  %s1294_s18 = smov 0   ;;  %s1296_s19 = smov 0  }
   0x3   :  { %s1298_s20 = smov 0   ;;  %s1300_s21 = smov 0  }
   0x4 LB: > { %s1313_s22 = sadd.s32 4294967295, %s1255_s21   ;;  %p39_p0 = scmp.ne.s32.totalorder %s1247_s19, %s1243_s18  ;;  %s1255_s21 = sphi %s1300_s21, %s1608_s21   ;;  %s1251_s20 = sphi %s1298_s20, %s1607_s20   ;;  %s1247_s19 = sphi %s1296_s19, %s1606_s19   ;;  %s1243_s18 = sphi %s1294_s18, %s1605_s18  }
   0x5   : > { %p1593_p1 = scmp.eq.s32.totalorder %s1313_s22, 0  ;;  %p861_p2 = scmp.ge.s32.totalorder %s1255_s21, 1 }
   0x6   : > { %p160_p3 = scmp.lt.s32.totalorder %s1255_s21, 5  ;;  %s1257_s25 = smov [#allocation4]  }
   0x7   : > { %p1321_p4 = por %p1593_p1, %p39_p0  ;;  %s172_s26 = sshll.u32 %s1257_s25, 4  ;;  %s173_s26 = int_to_ptr.vmem [resolvable:$true] %s172_s26 }
   0x8   : > { %p1325_p5 = pnand %p861_p2, %p160_p3  ;;  %s1338_s28 = sadd.s32 1, %s1255_s21  }
   0x9   : > { %s1596_s23 = scalar_select %p1321_p4, 1, 0 }
   0xa   : > { %s1597_s24 = scalar_select %p1325_p5, 1, 0 }
   0xb   : > { %p957_p6 = pneg %p1325_p5  ;;  %s26_s29 = sadd.s32 1, %s1251_s20 }
   0xc   : > { %s23_s30 = ssub.s32 %s1255_s21, %s1338_s28  ;;  %s1159_s8 = scalar_lea.hbm %s1588_s1, 2048 }
   0xd   : > { %p1333_p7 = pnand %p957_p6, %p1593_p1  ;;  %p1160_p8 = scmp.ne.s32.totalorder %s1588_s1, %s1159_s8 }
   0xe   : > { %p1166_p12 = scmp.lt.u32.totalorder %s1159_s8, %s1588_s1 }
   0xf   : > { %p1161_p9 = pneg %p1333_p7 }
  0x11   : > { %p1162_p10 = pnand %p1161_p9, %p1160_p8 }
  0x13   : > { %p1163_p11 = pneg %p1162_p10 }
  0x15   : > { %p1168_p13 = pnand %p1166_p12, %p1163_p11 }
  0x17   : > { %1171 = shalt.err (!%p1168_p13)
}
  0x18   : > { %s1172_s13 = scalar_lea.vmem %s173_s26, 2048  ;;  %p1180_p6 = scmp.lt.s32.totalorder %s173_s26, %s173_s26 }
  0x19   : > { %p1173_p0 = scmp.ne.s32.totalorder %s173_s26, %s1172_s13  ;;  %p1181_p1 = scmp.lt.s32.totalorder %s1172_s13, %s1172_s13 }
  0x1b   : > { %p1175_p2 = pnand %p1173_p0, %p1161_p9  ;;  %p1182_p4 = por %p1181_p1, %p1180_p6 }
  0x1d   : > { %p1176_p3 = pneg %p1175_p2 }
  0x1f   : > { %p1183_p5 = pnand %p1182_p4, %p1176_p3 }
  0x21   : > { %1186 = shalt.err (!%p1183_p5)
}
  0x22   : > { %s1258_s14 = smov 128   ;;  %s1259_s15 = smov 8  }
  0x23   : > { %960 = dma.hbm_to_vmem [thread:$0]  (!%p1333_p7), %s1588_s1, 2048, %s173_s26, [#allocation5], %s1258_s14, %s1258_s14, %s1259_s15  }
  0x24   : > { %p24_p1 = scmp.eq.s32.totalorder %s23_s30, 0  ;;  %p33_p4 = scmp.ne.s32.totalorder %s1251_s20, %s1247_s19 }
  0x25   : > { %p34_p5 = scmp.eq.s32.totalorder %s1255_s21, 0  ;;  %p966_p8 = scmp.lt.s32.totalorder %s1255_s21, 4 }
  0x26   : > { %s1367_s18 = scalar_select %p24_p1, %s1251_s20, %s26_s29  }
  0x27   : > { %p35_p9 = por %p34_p5, %p33_p4  ;;  %s195_s25 = sand.u32 1, %s1251_s20  }
  0x28   : > { %s864_s6 = sshll.u32 %s195_s25, 7  ;;  %s921_s7 = sshll.u32 %s1255_s21, 11 }
  0x29   : > { %s1374_s27 = scalar_lea.hbm %s1587_s0, %s921_s7  ;;  %s199_s26 = scalar_lea.vmem [#allocation2], %s864_s6 }
  0x2a   : > { %s206_s30 = sshll.u32 %s199_s26, 4  ;;  %p1378_p7 = pnand %p966_p8, %p35_p9  ;;  %s1376_s30 = int_to_ptr.vmem [resolvable:$true] %s206_s30 }
  0x2b   : > { %s1382_s21 = scalar_lea.sflag [#allocation3], %s195_s25  ;;  %s1187_s10 = scalar_lea.hbm %s1374_s27, 2048 }
  0x2c   : > { %p1188_p10 = scmp.ne.s32.totalorder %s1374_s27, %s1187_s10  ;;  %p1189_p11 = pneg %p1378_p7 }
  0x2d   : > { %s1192_s13 = scalar_lea.hbm %s1587_s0, 8192  ;;  %p1193_p0 = scmp.lt.u32.totalorder %s1374_s27, %s1587_s0 }
  0x2e   : > { %p1190_p12 = pnand %p1189_p11, %p1188_p10  ;;  %p1194_p2 = scmp.lt.u32.totalorder %s1192_s13, %s1187_s10 }
  0x2f   : > { %p1196_p6 = scmp.lt.u32.totalorder %s1187_s10, %s1374_s27 }
  0x30   : > { %p1191_p13 = pneg %p1190_p12  ;;  %p1195_p3 = por %p1194_p2, %p1193_p0 }
  0x32   : > { %p1197_p1 = por %p1196_p6, %p1195_p3 }
  0x34   : > { %p1198_p4 = pnand %p1197_p1, %p1191_p13 }
  0x36   : > { %1201 = shalt.err (!%p1198_p4)
}
  0x37   : > { %s1202_s25 = scalar_lea.vmem %s1376_s30, 2048  ;;  %s1260_s6 = smov [#allocation2]  }
  0x38   : > { %p1203_p5 = scmp.ne.s32.totalorder %s1376_s30, %s1202_s25  ;;  %s1207_s7 = sshll.u32 %s1260_s6, 4  ;;  %s1208_s7 = int_to_ptr.vmem [resolvable:$false] %s1207_s7 }
  0x39   : > { %s1209_s8 = scalar_lea.vmem %s1208_s7, 4096  ;;  %p1210_p10 = scmp.lt.s32.totalorder %s1376_s30, %s1208_s7 }
  0x3a   : > { %p1205_p8 = pnand %p1203_p5, %p1189_p11  ;;  %p1211_p12 = scmp.lt.s32.totalorder %s1209_s8, %s1202_s25 }
  0x3c   : > { %p1206_p9 = pneg %p1205_p8  ;;  %p1212_p0 = por %p1211_p12, %p1210_p10 }
  0x3e   : > { %p1213_p2 = pnand %p1212_p0, %p1206_p9 }
  0x40   : > { %1216 = shalt.err (!%p1213_p2)
}
  0x41   : > { %964 = dma.hbm_to_vmem [thread:$0]  (!%p1378_p7), %s1374_s27, 2048, %s1376_s30, %s1382_s21, %s1258_s14, %s1258_s14, %s1259_s15  }
  0x42   : > { %p1600_p11 = scmp.ne.s32.totalorder %s1597_s24, 0 }
  0x43   : > { %s220_s9 = sand.u32 (!%p1600_p11), 1, %s1247_s19   ;;  %p1601_p13 = scmp.ne.s32.totalorder (!%p1600_p11), %s1596_s23, 0 }
  0x44   : > { %218 = sbr.rel (%p1600_p11) target bundleno = 643 (0x283), region = 40  ;;  %s868_s26 = sshll.u32 (!%p1600_p11), %s220_s9, 7 }
  0x45   : > { %s221_s10 = scalar_lea.sflag (!%p1600_p11), [#allocation3], %s220_s9  ;;  %s1416_s11 = scalar_lea.vmem (!%p1600_p11), [#allocation2], %s868_s26 }
  0x4b   : > { %1234 = dma.done.wait (%p1601_p13), %s221_s10, 2048  }
  0x4c   : > { %1236 = vsyncadd (%p1601_p13), %s221_s10, 4294965248  ;;  %p1602_p3 = scmp.eq.s32.totalorder %s1313_s22, 0 }
  0x4e   : > { %1238 = dma.done.wait (%p1602_p3), [#allocation5], 2048   ;;  %p1603_p7 = pmov %p1602_p3 }
  0x4f   : > { %v1261_v0 = vmov 0   ;;  %v1007_v1 = vld [vmem:[#allocation4 + $0x4] ss:$8 sps:$4 sm:$0xff]   ;;  %v1009_v2 = vld [vmem:[#allocation4] ss:$8 sps:$4 sm:$0xff]   ;;  %v1438_v20 = vld [vmem:[%s1416_s11 + $0x10] sm:$0xff]  ;;  %v302_v43 = vlaneseq }
  0x50   : > { %1240 = vsyncadd (%p1603_p7), [#allocation5], 4294965248  ;;  %424 = vmatprep.mubr.bf16.mxu0 %v1261_v0  ;;  %1006 = vset.pattern.permute.xlu0 %v1261_v0  ;;  %v1010_v3 = vld [vmem:[#allocation4 + $0x14] ss:$8 sps:$4 sm:$0xff]   ;;  %v1012_v4 = vld [vmem:[#allocation4 + $0x10] ss:$8 sps:$4 sm:$0xff]  }
  0x51   : > { %392 = vmatprep.subr.bf16.mxu0 %v1007_v1  ;;  %v1013_v5 = vld [vmem:[#allocation4 + $0x24] ss:$8 sps:$4 sm:$0xff]   ;;  %v1015_v6 = vld [vmem:[#allocation4 + $0x20] ss:$8 sps:$4 sm:$0xff]   ;;  %v1016_v7 = vld [vmem:[#allocation4 + $0x34] ss:$8 sps:$4 sm:$0xff]  }
  0x52   : > { %393 = vmatpush1.bf16.msra.mxu0 %v1009_v2  ;;  %v1018_v8 = vld [vmem:[#allocation4 + $0x30] ss:$8 sps:$4 sm:$0xff]   ;;  %v1019_v9 = vld [vmem:[#allocation4 + $0x44] ss:$8 sps:$4 sm:$0xff]   ;;  %v1021_v10 = vld [vmem:[#allocation4 + $0x40] ss:$8 sps:$4 sm:$0xff]  }
  0x53   : > { %394 = vmatprep.subr.bf16.mxu0 %v1010_v3  ;;  %v1022_v11 = vld [vmem:[#allocation4 + $0x54] ss:$8 sps:$4 sm:$0xff]   ;;  %v1024_v12 = vld [vmem:[#allocation4 + $0x50] ss:$8 sps:$4 sm:$0xff]   ;;  %v1025_v13 = vld [vmem:[#allocation4 + $0x64] ss:$8 sps:$4 sm:$0xff]  }
  0x54   : > { %v1027_v14 = vld [vmem:[#allocation4 + $0x60] ss:$8 sps:$4 sm:$0xff]   ;;  %v1028_v15 = vld [vmem:[#allocation4 + $0x74] ss:$8 sps:$4 sm:$0xff]   ;;  %v1030_v16 = vld [vmem:[#allocation4 + $0x70] ss:$8 sps:$4 sm:$0xff]  }
  0x55   : > { %v1429_v17 = vld [vmem:[%s1416_s11] sm:$0xff]  ;;  %v1432_v18 = vld [vmem:[%s1416_s11 + $0x8] sm:$0xff]  ;;  %v1441_v21 = vld [vmem:[%s1416_s11 + $0x18] sm:$0xff]  ;;  %v1262_v41 = vmov 0.0   ;;  %vm1263_vm0 = vmmov 0   ;;  %v303_v44 = vshrl.u32 %v302_v43, 7 }
  0x56   : > { %395 = vmatpush1.bf16.msra.mxu0 %v1012_v4  ;;  %v276_v19 = vpack.c.bf16 %v1432_v18, %v1429_v17  ;;  %v277_v22 = vpack.c.bf16 %v1441_v21, %v1438_v20  ;;  %v1447_v23 = vld [vmem:[%s1416_s11 + $0x20] sm:$0xff]  ;;  %v1450_v24 = vld [vmem:[%s1416_s11 + $0x28] sm:$0xff]  ;;  %v1456_v26 = vld [vmem:[%s1416_s11 + $0x30] sm:$0xff]  ;;  %931 = vmatprep.subr.bf16.mxu1 %v1262_v41  ;;  %p255_p6 = scmp.lt.s32.totalorder %s1313_s22, 3 }
  0x57   : > { %396 = vmatprep.subr.bf16.mxu0 %v1013_v5  ;;  %v278_v25 = vpack.c.bf16 %v1450_v24, %v1447_v23  ;;  %v1459_v27 = vld [vmem:[%s1416_s11 + $0x38] sm:$0xff]  ;;  %v1465_v29 = vld [vmem:[%s1416_s11 + $0x40] sm:$0xff]  ;;  %v1468_v30 = vld [vmem:[%s1416_s11 + $0x48] sm:$0xff]  ;;  %947 = vmatprep.mubr.msk.bf16.mxu1 %vm1263_vm0, %v1262_v41  ;;  %v304_v45 = vsub.s32 0, %v303_v44  ;;  %v308_v47 = vsub.s32 1, %v303_v44 }
  0x58   : > { %v279_v28 = vpack.c.bf16 %v1459_v27, %v1456_v26  ;;  %v280_v31 = vpack.c.bf16 %v1468_v30, %v1465_v29  ;;  %v1474_v32 = vld [vmem:[%s1416_s11 + $0x50] sm:$0xff]  ;;  %v1477_v33 = vld [vmem:[%s1416_s11 + $0x58] sm:$0xff]  ;;  %v1483_v35 = vld [vmem:[%s1416_s11 + $0x60] sm:$0xff]  ;;  %s1610_s22 = smov (!%p255_p6, %s1313_s22), 3 }
  0x59   : > { %v281_v34 = vpack.c.bf16 %v1477_v33, %v1474_v32  ;;  %v1486_v36 = vld [vmem:[%s1416_s11 + $0x68] sm:$0xff]  ;;  %v1492_v38 = vld [vmem:[%s1416_s11 + $0x70] sm:$0xff]  ;;  %v1495_v39 = vld [vmem:[%s1416_s11 + $0x78] sm:$0xff]  ;;  %s870_s29 = sshll.u32 %s1610_s22, 3 }
  0x5a   : > { %397 = vmatpush1.bf16.msra.mxu0 %v1015_v6  ;;  %v282_v37 = vpack.c.bf16 %v1486_v36, %v1483_v35  ;;  %v283_v40 = vpack.c.bf16 %v1495_v39, %v1492_v38  ;;  %v738_v42 = vld [vmem:[%s1591_s4] sm:$0xff]  ;;  %s258_s13 = scalar_lea.vmem %s1592_s5, %s870_s29 }
  0x5b   : > { %398 = vmatprep.subr.bf16.mxu0 %v1016_v7  ;;  %741 = vperm.xlu0 %1006, %v738_v42   ;;  %v300_v46 = vld [vmem:[%s1589_s2] sm:$0x3] }
  0x5c   : > { %v1507_v48 = vrot.slane %v300_v46, %v304_v45  ;;  %v1509_v49 = vrot.slane %v300_v46, %v308_v47 }
  0x5e   : > { %399 = vmatpush1.bf16.msra.mxu0 %v1018_v8 }
  0x5f   : > { %400 = vmatprep.subr.bf16.mxu0 %v1019_v9 }
  0x62   : > { %401 = vmatpush1.bf16.msra.mxu0 %v1021_v10 }
  0x63   : > { %402 = vmatprep.subr.bf16.mxu0 %v1022_v11 }
  0x66   : > { %403 = vmatpush1.bf16.msra.mxu0 %v1024_v12 }
  0x67   : > { %404 = vmatprep.subr.bf16.mxu0 %v1025_v13 }
  0x6a   : > { %405 = vmatpush1.bf16.msra.mxu0 %v1027_v14 }
  0x6b   : > { %406 = vmatprep.subr.bf16.mxu0 %v1028_v15 }
  0x6e   : > { %407 = vmatpush1.bf16.msra.mxu0 %v1030_v16 }
  0x71   : > { %425 = vmatmul.mubr.bf16.vlgmr.msra.gmra.mrb[0].mxu0 %v276_v19 }
  0x72   : > { %434 = vmatprep.mubr.bf16.mxu0 %v1261_v0 }
  0x79   : > { %435 = vmatmul.mubr.bf16.gmra.mrb[4].mxu0 %v277_v22 }
  0x7a   : > { %444 = vmatprep.mubr.bf16.mxu0 %v1261_v0 }
  0x81   : > { %445 = vmatmul.mubr.bf16.gmra.mrb[8].mxu0 %v278_v25 }
  0x82   : > { %454 = vmatprep.mubr.bf16.mxu0 %v1261_v0 }
  0x89   : > { %455 = vmatmul.mubr.bf16.gmra.mrb[12].mxu0 %v279_v28 }
  0x8a   : > { %464 = vmatprep.mubr.bf16.mxu0 %v1261_v0 }
  0x91   : > { %465 = vmatmul.mubr.bf16.gmra.mrb[16].mxu0 %v280_v31 }
  0x92   : > { %474 = vmatprep.mubr.bf16.mxu0 %v1261_v0 }
  0x99   : > { %475 = vmatmul.mubr.bf16.gmra.mrb[20].mxu0 %v281_v34 }
  0x9a   : > { %484 = vmatprep.mubr.bf16.mxu0 %v1261_v0 }
  0xa1   : > { %485 = vmatmul.mubr.bf16.gmra.mrb[24].mxu0 %v282_v37 }
  0xa2   : > { %494 = vmatprep.mubr.bf16.mxu0 %v1261_v0 }
  0xa9   : > { %495 = vmatmul.mubr.bf16.gmra.mrb[28].mxu0 %v283_v40 }
 0x144   : > { %v426_v50 = vpop.f32.mrb[0].mxu0 }
 0x145   : > { %v427_v51 = vadd.f32 %v426_v50, %v1507_v48  ;;  %v428_v52 = vpop.f32.mrb[1].mxu0 }
 0x146   : > { %v429_v53 = vadd.f32 %v428_v52, %v1509_v49  ;;  %v430_v54 = vpop.f32.mrb[2].mxu0 }
 0x147   : > { %v887_v55 = vmul.f32 -1.442695, %v427_v51  ;;  %v431_v56 = vadd.f32 %v430_v54, %v1507_v48  ;;  %v432_v57 = vpop.f32.mrb[3].mxu0 }
 0x148   : > { %v888_v58 = vmul.f32 -1.442695, %v429_v53  ;;  %v433_v59 = vadd.f32 %v432_v57, %v1509_v49 }
 0x149   : > { %1031 = vpow2.f32 %v887_v55  ;;  %v889_v60 = vmul.f32 -1.442695, %v431_v56 }
 0x14a   : > { %1033 = vpow2.f32 %v888_v58  ;;  %v890_v61 = vmul.f32 -1.442695, %v433_v59 }
 0x14b   : > { %1035 = vpow2.f32 %v889_v60 }
 0x14c   : > { %1037 = vpow2.f32 %v890_v61  ;;  %v436_v62 = vpop.f32.mrb[4].mxu0 }
 0x14d   : > { %v437_v63 = vadd.f32 %v436_v62, %v1507_v48  ;;  %v438_v0 = vpop.f32.mrb[5].mxu0 }
 0x14e   : > { %v439_v1 = vadd.f32 %v438_v0, %v1509_v49  ;;  %v440_v2 = vpop.f32.mrb[6].mxu0 }
 0x14f   : > { %v891_v3 = vmul.f32 -1.442695, %v437_v63  ;;  %v441_v4 = vadd.f32 %v440_v2, %v1507_v48  ;;  %v442_v5 = vpop.f32.mrb[7].mxu0 }
 0x150   : > { %v892_v6 = vmul.f32 -1.442695, %v439_v1  ;;  %v443_v7 = vadd.f32 %v442_v5, %v1509_v49 }
 0x151   : > { %1039 = vpow2.f32 %v891_v3  ;;  %v893_v8 = vmul.f32 -1.442695, %v441_v4 }
 0x152   : > { %1041 = vpow2.f32 %v892_v6  ;;  %v894_v9 = vmul.f32 -1.442695, %v443_v7 }
 0x153   : > { %v1032_v10 = vpop.eup %1031  ;;  %1043 = vpow2.f32 %v893_v8 }
 0x154   : > { %v1034_v11 = vpop.eup %1033  ;;  %v601_v12 = vadd.f32 1.0, %v1032_v10  ;;  %1045 = vpow2.f32 %v894_v9  ;;  %v446_v13 = vpop.f32.mrb[8].mxu0 }
 0x155   : > { %v1036_v14 = vpop.eup %1035  ;;  %v602_v15 = vadd.f32 1.0, %v1034_v11  ;;  %v447_v16 = vadd.f32 %v446_v13, %v1507_v48  ;;  %v448_v19 = vpop.f32.mrb[9].mxu0 }
 0x156   : > { %v1038_v22 = vpop.eup %1037  ;;  %1047 = vrcp.f32 %v601_v12  ;;  %v603_v25 = vadd.f32 1.0, %v1036_v14  ;;  %v449_v28 = vadd.f32 %v448_v19, %v1509_v49  ;;  %v450_v31 = vpop.f32.mrb[10].mxu0 }
 0x157   : > { %1049 = vrcp.f32 %v602_v15  ;;  %v604_v34 = vadd.f32 1.0, %v1038_v22  ;;  %v895_v37 = vmul.f32 -1.442695, %v447_v16  ;;  %v451_v40 = vadd.f32 %v450_v31, %v1507_v48  ;;  %v452_v42 = vpop.f32.mrb[11].mxu0 }
 0x158   : > { %1051 = vrcp.f32 %v603_v25  ;;  %v896_v43 = vmul.f32 -1.442695, %v449_v28  ;;  %v453_v44 = vadd.f32 %v452_v42, %v1509_v49 }
 0x159   : > { %1053 = vrcp.f32 %v604_v34  ;;  %v897_v45 = vmul.f32 -1.442695, %v451_v40 }
 0x15a   : > { %1055 = vpow2.f32 %v895_v37  ;;  %v898_v46 = vmul.f32 -1.442695, %v453_v44 }
 0x15b   : > { %v1040_v47 = vpop.eup %1039  ;;  %1057 = vpow2.f32 %v896_v43 }
 0x15c   : > { %v1042_v50 = vpop.eup %1041  ;;  %v605_v51 = vadd.f32 1.0, %v1040_v47  ;;  %1059 = vpow2.f32 %v897_v45  ;;  %v456_v52 = vpop.f32.mrb[12].mxu0 }
 0x15d   : > { %v1044_v53 = vpop.eup %1043  ;;  %v606_v54 = vadd.f32 1.0, %v1042_v50  ;;  %1061 = vpow2.f32 %v898_v46  ;;  %v457_v55 = vadd.f32 %v456_v52, %v1507_v48  ;;  %v458_v56 = vpop.f32.mrb[13].mxu0 }
 0x15e   : > { %v1046_v57 = vpop.eup %1045  ;;  %1063 = vrcp.f32 %v605_v51  ;;  %v607_v58 = vadd.f32 1.0, %v1044_v53  ;;  %v459_v59 = vadd.f32 %v458_v56, %v1509_v49  ;;  %v460_v60 = vpop.f32.mrb[14].mxu0 }
 0x15f   : > { %1065 = vrcp.f32 %v606_v54  ;;  %v608_v61 = vadd.f32 1.0, %v1046_v57  ;;  %v899_v62 = vmul.f32 -1.442695, %v457_v55  ;;  %v461_v63 = vadd.f32 %v460_v60, %v1507_v48  ;;  %v462_v0 = vpop.f32.mrb[15].mxu0 }
 0x160   : > { %v1048_v1 = vpop.eup %1047  ;;  %1067 = vrcp.f32 %v607_v58  ;;  %v900_v2 = vmul.f32 -1.442695, %v459_v59  ;;  %v463_v3 = vadd.f32 %v462_v0, %v1509_v49 }
 0x161   : > { %v1050_v4 = vpop.eup %1049  ;;  %1069 = vrcp.f32 %v608_v61  ;;  %v901_v5 = vmul.f32 -1.442695, %v461_v63 }
 0x162   : > { %v1052_v6 = vpop.eup %1051  ;;  %1071 = vpow2.f32 %v899_v62  ;;  %v902_v7 = vmul.f32 -1.442695, %v463_v3  ;;  %v697_v8 = vmul.f32 %v1050_v4, %v1048_v1 }
 0x163   : > { %v1054_v9 = vpop.eup %1053  ;;  %1073 = vpow2.f32 %v900_v2 }
 0x164   : > { %v1056_v10 = vpop.eup %1055  ;;  %1075 = vpow2.f32 %v901_v5  ;;  %v466_v11 = vpop.f32.mrb[16].mxu0  ;;  %v698_v12 = vmul.f32 %v1054_v9, %v1052_v6  ;;  %v713_v31 = vmul.f32 %v697_v8, %v1429_v17 }
 0x165   : > { %v1058_v13 = vpop.eup %1057  ;;  %v609_v14 = vadd.f32 1.0, %v1056_v10  ;;  %1077 = vpow2.f32 %v902_v7  ;;  %v467_v15 = vadd.f32 %v466_v11, %v1507_v48  ;;  %v468_v16 = vpop.f32.mrb[17].mxu0 }
 0x166   : > { %v1060_v19 = vpop.eup %1059  ;;  %v610_v22 = vadd.f32 1.0, %v1058_v13  ;;  %v469_v25 = vadd.f32 %v468_v16, %v1509_v49  ;;  %v470_v28 = vpop.f32.mrb[18].mxu0  ;;  %v714_v34 = vmul.f32 %v698_v12, %v1432_v18 }
 0x167   : > { %v1062_v37 = vpop.eup %1061  ;;  %1079 = vrcp.f32 %v609_v14  ;;  %v611_v40 = vadd.f32 1.0, %v1060_v19  ;;  %v903_v42 = vmul.f32 -1.442695, %v467_v15  ;;  %v471_v43 = vadd.f32 %v470_v28, %v1507_v48  ;;  %v472_v44 = vpop.f32.mrb[19].mxu0 }
 0x168   : > { %v1064_v45 = vpop.eup %1063  ;;  %1081 = vrcp.f32 %v610_v22  ;;  %v612_v46 = vadd.f32 1.0, %v1062_v37  ;;  %v904_v47 = vmul.f32 -1.442695, %v469_v25  ;;  %v473_v50 = vadd.f32 %v472_v44, %v1509_v49 }
 0x169   : > { %v1066_v51 = vpop.eup %1065  ;;  %1083 = vrcp.f32 %v611_v40  ;;  %v905_v52 = vmul.f32 -1.442695, %v471_v43  ;;  %v730_v53 = vpack.c.bf16 %v714_v34, %v713_v31 }
 0x16a   : > { %v1068_v17 = vpop.eup %1067  ;;  %1085 = vrcp.f32 %v612_v46  ;;  %v906_v18 = vmul.f32 -1.442695, %v473_v50  ;;  %v699_v54 = vmul.f32 %v1066_v51, %v1064_v45 }
 0x16b   : > { %v1070_v55 = vpop.eup %1069  ;;  %1087 = vpow2.f32 %v903_v42  ;;  %932 = vmatpush3.bf16.xpose.msra.mxu1 %v730_v53 }
 0x16c   : > { %v1072_v56 = vpop.eup %1071  ;;  %1089 = vpow2.f32 %v904_v47  ;;  %v476_v57 = vpop.f32.mrb[20].mxu0  ;;  %933 = vmatprep.subr.bf16.mxu1 %v1262_v41  ;;  %v700_v58 = vmul.f32 %v1070_v55, %v1068_v17  ;;  %v715_v63 = vmul.f32 %v699_v54, %v1438_v20 }
 0x16d   : > { %v1074_v59 = vpop.eup %1073  ;;  %v613_v60 = vadd.f32 1.0, %v1072_v56  ;;  %1091 = vpow2.f32 %v905_v52  ;;  %v477_v61 = vadd.f32 %v476_v57, %v1507_v48  ;;  %v478_v62 = vpop.f32.mrb[21].mxu0 }
 0x16e   : > { %v1076_v0 = vpop.eup %1075  ;;  %v614_v1 = vadd.f32 1.0, %v1074_v59  ;;  %1093 = vpow2.f32 %v906_v18  ;;  %v479_v2 = vadd.f32 %v478_v62, %v1509_v49  ;;  %v480_v3 = vpop.f32.mrb[22].mxu0  ;;  %v716_v4 = vmul.f32 %v700_v58, %v1441_v21 }
 0x16f   : > { %v1078_v5 = vpop.eup %1077  ;;  %1095 = vrcp.f32 %v613_v60  ;;  %v615_v6 = vadd.f32 1.0, %v1076_v0  ;;  %v907_v7 = vmul.f32 -1.442695, %v477_v61  ;;  %v481_v8 = vadd.f32 %v480_v3, %v1507_v48  ;;  %v482_v9 = vpop.f32.mrb[23].mxu0 }
 0x170   : > { %1097 = vrcp.f32 %v614_v1  ;;  %v616_v10 = vadd.f32 1.0, %v1078_v5  ;;  %v908_v11 = vmul.f32 -1.442695, %v479_v2  ;;  %v483_v20 = vadd.f32 %v482_v9, %v1509_v49 }
 0x171   : > { %v1080_v12 = vpop.eup %1079  ;;  %1099 = vrcp.f32 %v615_v6  ;;  %v909_v13 = vmul.f32 -1.442695, %v481_v8  ;;  %v731_v14 = vpack.c.bf16 %v716_v4, %v715_v63 }
 0x172   : > { %v1082_v15 = vpop.eup %1081  ;;  %1101 = vrcp.f32 %v616_v10  ;;  %v910_v16 = vmul.f32 -1.442695, %v483_v20 }
 0x173   : > { %v1084_v21 = vpop.eup %1083  ;;  %1103 = vpow2.f32 %v907_v7  ;;  %934 = vmatpush3.bf16.xpose.msra.mxu1 %v731_v14  ;;  %v701_v19 = vmul.f32 %v1082_v15, %v1080_v12 }
 0x174   : > { %v1086_v22 = vpop.eup %1085  ;;  %1105 = vpow2.f32 %v908_v11  ;;  %v486_v25 = vpop.f32.mrb[24].mxu0  ;;  %935 = vmatprep.subr.bf16.mxu1 %v1262_v41 }
 0x175   : > { %v1088_v28 = vpop.eup %1087  ;;  %1107 = vpow2.f32 %v909_v13  ;;  %v487_v31 = vadd.f32 %v486_v25, %v1507_v48  ;;  %v488_v34 = vpop.f32.mrb[25].mxu0  ;;  %v702_v37 = vmul.f32 %v1086_v22, %v1084_v21  ;;  %v717_v51 = vmul.f32 %v701_v19, %v1447_v23 }
 0x176   : > { %v1090_v40 = vpop.eup %1089  ;;  %v617_v42 = vadd.f32 1.0, %v1088_v28  ;;  %1109 = vpow2.f32 %v910_v16  ;;  %v489_v43 = vadd.f32 %v488_v34, %v1509_v49  ;;  %v490_v44 = vpop.f32.mrb[26].mxu0 }
 0x177   : > { %v1092_v45 = vpop.eup %1091  ;;  %v618_v46 = vadd.f32 1.0, %v1090_v40  ;;  %v491_v47 = vadd.f32 %v490_v44, %v1507_v48  ;;  %v492_v50 = vpop.f32.mrb[27].mxu0  ;;  %v718_v52 = vmul.f32 %v702_v37, %v1450_v24  ;;  %v911_v18 = vmul.f32 -1.442695, %v487_v31 }
 0x178   : > { %v1094_v53 = vpop.eup %1093  ;;  %1111 = vrcp.f32 %v617_v42  ;;  %v619_v17 = vadd.f32 1.0, %v1092_v45  ;;  %v493_v54 = vadd.f32 %v492_v50, %v1509_v49  ;;  %v912_v57 = vmul.f32 -1.442695, %v489_v43 }
 0x179   : > { %v1096_v55 = vpop.eup %1095  ;;  %1113 = vrcp.f32 %v618_v46  ;;  %v620_v56 = vadd.f32 1.0, %v1094_v53  ;;  %v732_v58 = vpack.c.bf16 %v718_v52, %v717_v51  ;;  %v913_v60 = vmul.f32 -1.442695, %v491_v47 }
 0x17a   : > { %v1098_v59 = vpop.eup %1097  ;;  %1115 = vrcp.f32 %v619_v17  ;;  %v914_v62 = vmul.f32 -1.442695, %v493_v54 }
 0x17b   : > { %v1100_v61 = vpop.eup %1099  ;;  %1117 = vrcp.f32 %v620_v56  ;;  %936 = vmatpush3.bf16.xpose.msra.mxu1 %v732_v58  ;;  %v703_v23 = vmul.f32 %v1098_v59, %v1096_v55 }
 0x17c   : > { %v1102_v24 = vpop.eup %1101  ;;  %1119 = vpow2.f32 %v911_v18  ;;  %v496_v63 = vpop.f32.mrb[28].mxu0  ;;  %937 = vmatprep.subr.bf16.mxu1 %v1262_v41 }
 0x17d   : > { %v1104_v0 = vpop.eup %1103  ;;  %1121 = vpow2.f32 %v912_v57  ;;  %v497_v1 = vadd.f32 %v496_v63, %v1507_v48  ;;  %v498_v2 = vpop.f32.mrb[29].mxu0  ;;  %v704_v3 = vmul.f32 %v1102_v24, %v1100_v61  ;;  %v719_v20 = vmul.f32 %v703_v23, %v1456_v26 }
 0x17e   : > { %v1106_v4 = vpop.eup %1105  ;;  %v621_v5 = vadd.f32 1.0, %v1104_v0  ;;  %1123 = vpow2.f32 %v913_v60  ;;  %v499_v6 = vadd.f32 %v498_v2, %v1509_v49  ;;  %v500_v7 = vpop.f32.mrb[30].mxu0 }
 0x17f   : > { %v1108_v8 = vpop.eup %1107  ;;  %v622_v9 = vadd.f32 1.0, %v1106_v4  ;;  %1125 = vpow2.f32 %v914_v62  ;;  %v501_v10 = vadd.f32 %v500_v7, %v1507_v48  ;;  %v502_v11 = vpop.f32.mrb[31].mxu0  ;;  %v915_v14 = vmul.f32 -1.442695, %v497_v1 }
 0x180   : > { %v1110_v12 = vpop.eup %1109  ;;  %1127 = vrcp.f32 %v621_v5  ;;  %v623_v13 = vadd.f32 1.0, %v1108_v8  ;;  %v503_v15 = vadd.f32 %v502_v11, %v1509_v49  ;;  %v916_v21 = vmul.f32 -1.442695, %v499_v6 }
 0x181   : > { %1129 = vrcp.f32 %v622_v9  ;;  %v624_v16 = vadd.f32 1.0, %v1110_v12  ;;  %v720_v19 = vmul.f32 %v704_v3, %v1459_v27  ;;  %v917_v25 = vmul.f32 -1.442695, %v501_v10 }
 0x182   : > { %v1112_v22 = vpop.eup %1111  ;;  %1131 = vrcp.f32 %v623_v13  ;;  %v918_v48 = vmul.f32 -1.442695, %v503_v15 }
 0x183   : > { %v1114_v28 = vpop.eup %1113  ;;  %1133 = vrcp.f32 %v624_v16  ;;  %v733_v31 = vpack.c.bf16 %v720_v19, %v719_v20 }
 0x184   : > { %v1116_v34 = vpop.eup %1115  ;;  %1135 = vpow2.f32 %v915_v14  ;;  %v705_v26 = vmul.f32 %v1114_v28, %v1112_v22 }
 0x185   : > { %v1118_v37 = vpop.eup %1117  ;;  %1137 = vpow2.f32 %v916_v21  ;;  %938 = vmatpush3.bf16.xpose.msra.mxu1 %v733_v31 }
 0x186   : > { %v1120_v40 = vpop.eup %1119  ;;  %1139 = vpow2.f32 %v917_v25  ;;  %939 = vmatprep.subr.bf16.mxu1 %v1262_v41  ;;  %v706_v49 = vmul.f32 %v1118_v37, %v1116_v34  ;;  %v721_v45 = vmul.f32 %v705_v26, %v1465_v29 }
 0x187   : > { %v1122_v42 = vpop.eup %1121  ;;  %v625_v27 = vadd.f32 1.0, %v1120_v40  ;;  %1141 = vpow2.f32 %v918_v48 }
 0x188   : > { %v1124_v43 = vpop.eup %1123  ;;  %v626_v44 = vadd.f32 1.0, %v1122_v42  ;;  %v722_v46 = vmul.f32 %v706_v49, %v1468_v30 }
 0x189   : > { %v1126_v47 = vpop.eup %1125  ;;  %1143 = vrcp.f32 %v625_v27  ;;  %v627_v50 = vadd.f32 1.0, %v1124_v43 }
 0x18a   : > { %v1128_v51 = vpop.eup %1127  ;;  %1145 = vrcp.f32 %v626_v44  ;;  %v628_v52 = vadd.f32 1.0, %v1126_v47  ;;  %v734_v53 = vpack.c.bf16 %v722_v46, %v721_v45 }
 0x18b   : > { %v1130_v17 = vpop.eup %1129  ;;  %1147 = vrcp.f32 %v627_v50 }
 0x18c   : > { %v1132_v18 = vpop.eup %1131  ;;  %1149 = vrcp.f32 %v628_v52  ;;  %v707_v54 = vmul.f32 %v1130_v17, %v1128_v51 }
 0x18d   : > { %v1134_v55 = vpop.eup %1133  ;;  %940 = vmatpush3.bf16.xpose.msra.mxu1 %v734_v53 }
 0x18e   : > { %v1136_v56 = vpop.eup %1135  ;;  %941 = vmatprep.subr.bf16.mxu1 %v1262_v41  ;;  %v708_v29 = vmul.f32 %v1134_v55, %v1132_v18  ;;  %v723_v60 = vmul.f32 %v707_v54, %v1474_v32 }
 0x18f   : > { %v1138_v57 = vpop.eup %1137  ;;  %v629_v30 = vadd.f32 1.0, %v1136_v56 }
 0x190   : > { %v1140_v58 = vpop.eup %1139  ;;  %v630_v59 = vadd.f32 1.0, %v1138_v57  ;;  %v724_v61 = vmul.f32 %v708_v29, %v1477_v33 }
 0x191   : > { %v1142_v62 = vpop.eup %1141  ;;  %1151 = vrcp.f32 %v629_v30  ;;  %v631_v23 = vadd.f32 1.0, %v1140_v58 }
 0x192   : > { %1153 = vrcp.f32 %v630_v59  ;;  %v632_v24 = vadd.f32 1.0, %v1142_v62  ;;  %v735_v63 = vpack.c.bf16 %v724_v61, %v723_v60 }
 0x193   : > { %v1144_v0 = vpop.eup %1143  ;;  %1155 = vrcp.f32 %v631_v23 }
 0x194   : > { %v1146_v1 = vpop.eup %1145  ;;  %1157 = vrcp.f32 %v632_v24 }
 0x195   : > { %v1148_v2 = vpop.eup %1147  ;;  %942 = vmatpush3.bf16.xpose.msra.mxu1 %v735_v63  ;;  %v709_v3 = vmul.f32 %v1146_v1, %v1144_v0 }
 0x196   : > { %v1150_v4 = vpop.eup %1149  ;;  %943 = vmatprep.subr.bf16.mxu1 %v1262_v41 }
 0x197   : > { %v710_v5 = vmul.f32 %v1150_v4, %v1148_v2  ;;  %v725_v32 = vmul.f32 %v709_v3, %v1483_v35  ;;  %v729_v35 = vld [vmem:[%s1590_s3] sm:$0xf] }
 0x199   : > { %v726_v33 = vmul.f32 %v710_v5, %v1486_v36  ;;  %v742_v36 = vpop.permute.xlu0 %741 }
 0x19b   : > { %v1152_v6 = vpop.eup %1151  ;;  %v736_v7 = vpack.c.bf16 %v726_v33, %v725_v32 }
 0x19c   : > { %v1154_v8 = vpop.eup %1153 }
 0x19d   : > { %v1156_v9 = vpop.eup %1155  ;;  %944 = vmatpush3.bf16.xpose.msra.mxu1 %v736_v7  ;;  %v711_v10 = vmul.f32 %v1154_v8, %v1152_v6 }
 0x19e   : > { %v1158_v11 = vpop.eup %1157  ;;  %945 = vmatprep.subr.bf16.mxu1 %v1262_v41 }
 0x19f   : > { %v712_v20 = vmul.f32 %v1158_v11, %v1156_v9  ;;  %v727_v12 = vmul.f32 %v711_v10, %v1492_v38 }
 0x1a1   : > { %v728_v13 = vmul.f32 %v712_v20, %v1495_v39 }
 0x1a3   : > { %v737_v14 = vpack.c.bf16 %v728_v13, %v727_v12 }
 0x1a5   : > { %946 = vmatpush3.bf16.xpose.msra.mxu1 %v737_v14 }
 0x1ac   : > { %948 = vmatmul.mubr.bf16.vlgmr.msra.gmra.mrb[0].mxu1 %v729_v35 }
 0x27f   : > { %v778_v41 = vpop.f32.mrb[0].mxu1 }
 0x280   : > { %v779_v15 = vadd.f32 %v778_v41, %v742_v36  ;;  %v949_v38 = vpop.f32.mrb[1].mxu1 }
 0x281   : > { %v781_v16 = vpop.f32.mrb[2].mxu1 }
 0x282   : > { %784 = vst [vmem:[%s258_s13] sm:$0xff] %v779_v15  ;;  %v950_v39 = vpop.f32.mrb[3].mxu1 }
 0x283 PF: > { %s1604_s16 = smov %s1367_s18  ;;  %p16_p1 = scmp.ge.s32.totalorder %s1338_s28, 6  }
 0x284   : > { %s1605_s18 = smov %s1247_s19  ;;  %s1606_s19 = smov %s1251_s20 }
 0x285   : > { %s1607_s20 = smov %s1604_s16  ;;  %s1608_s21 = smov %s1338_s28 }
 0x286   :  { %18 = sbr.rel (!%p16_p1) target bundleno = 4 (0x4), region = 84 }
 0x28d   :  { %804 = vsyncpa [#allocation3], 1 }
 0x28e   :  { %806 = vsyncpa [#allocation3 + $0x1], 1 }
 0x28f   :  { %807 = vsyncpa [#allocation5], 1 }

</bundles_post_ra>
